<compile_context>
chip_gen: v5e
topology: v5e:2x2
jax: 0.10.0
libtpu: 0.0.40
codegen_flags: <defaults>
</compile_context>

<pallas_src>
import math

import jax
import jax.numpy as jnp
from jax import lax
from jax.experimental import pallas as pl
from jax.experimental.pallas import tpu as pltpu

# ----------------------------- model dims -----------------------------------
B = 2           # batch
S = 8           # sequence length
D = 32          # d_model
H = 4           # num_heads
DK = D // H     # head dim (= d_v)
DFF = 64        # d_ff
THETA = 10000.0
EPS = 1e-5

BS = B * S      # 16: flattened (batch, seq) rows
BHS = B * H * S  # 64: block-diagonal K/V rows, ordered (head, batch, seq)
SCALE = 1.0 / math.sqrt(DK)


# ----------------------------- Pallas kernel --------------------------------
def transformer_block_kernel(
    x_ref,        # (BS, D)    flattened activations
    g1_ref,       # (1, D)     RMSNorm1 gain
    wqkv_ref,     # (D, 5D)    [Wq^T | Wk^T | Wv^T | Wq^T P | Wk^T P]
    cos_ref,      # (BS, D)    interleaved cos table (tiled over batch)
    sins_ref,     # (BS, D)    interleaved signed sin table
    wo_t_ref,     # (D, D)     W_O^T
    g2_ref,       # (1, D)     RMSNorm2 gain
    w13_ref,      # (D, 2*DFF) [W1^T | W3^T]
    w2_t_ref,     # (DFF, D)   W2^T
    bd_ref,       # (BHS, D)   block-diagonal head mask (0/1)
    seg_ref,      # (BHS, BHS) segmented-softmax ones (same (head,batch) block)
    bias_ref,     # (BS, BHS)  additive 0/-inf mask (causal AND same-batch)
    dfix_ref,     # (BS, BHS)  1.0 on wrong-batch columns (denominator fixup)
    out_ref,      # (BS, D)
):
    x = x_ref[...]                                           # (BS, D) f32

    # ---- RMSNorm 1 (rsqrt -> EUP) ----
    inv1 = lax.rsqrt(jnp.mean(x * x, axis=-1, keepdims=True) + EPS)
    h = x * g1_ref[...] * inv1                               # (BS, D)

    # ---- fused Q/K/V (+ RoPE-swapped Q/K) projection: one wide MXU matmul ----
    qkv = jnp.dot(h, wqkv_ref[...], preferred_element_type=jnp.float32)  # (BS, 5D)
    q = qkv[:, 0 * D:1 * D]
    k = qkv[:, 1 * D:2 * D]
    v = qkv[:, 2 * D:3 * D]
    qs = qkv[:, 3 * D:4 * D]          # q @ P  (adjacent-pair swap, folded into weight)
    ks = qkv[:, 4 * D:5 * D]          # k @ P

    # ---- RoPE: rot(x) = x*cos + swap(x)*sin_signed ----
    cos = cos_ref[...]
    sins = sins_ref[...]
    q = q * cos + qs * sins
    k = k * cos + ks * sins

    # ---- block-diagonal K/V for ALL (head, batch) blocks at once ----
    bd = bd_ref[...]                                         # (BHS, D)
    kbd = jnp.tile(k, (H, 1)) * bd                           # (BHS, D)
    vbd = jnp.tile(v, (H, 1)) * bd                           # (BHS, D)

    # ---- all heads, all batches in one contraction: (BS,D)x(BHS,D)^T ----
    s = lax.dot_general(q, kbd, (((1,), (1,)), ((), ())),
                        preferred_element_type=jnp.float32) * SCALE
    s = s + bias_ref[...]                                    # causal + same-batch
    # single row-max shift (softmax-invariant; safe at these score magnitudes)
    m = jnp.max(s, axis=-1, keepdims=True)
    e = jnp.exp(s - m)
    # segmented (per head,batch block) denominator via one matmul;
    # dfix keeps wrong-batch columns (e==0, block-sum==0) from producing NaN.
    denom = jnp.dot(e, seg_ref[...], preferred_element_type=jnp.float32) + dfix_ref[...]
    r = pl.reciprocal(denom, approx=True)                    # EUP
    r = r * (2.0 - denom * r)                                # one Newton step
    p = e * r
    # P @ V_blockdiag lands head outputs already concatenated: (BS, D)
    attn = jnp.dot(p, vbd, preferred_element_type=jnp.float32)

    y = x + jnp.dot(attn, wo_t_ref[...], preferred_element_type=jnp.float32)

    # ---- RMSNorm 2 ----
    inv2 = lax.rsqrt(jnp.mean(y * y, axis=-1, keepdims=True) + EPS)
    h2 = y * g2_ref[...] * inv2

    # ---- SwiGLU feed-forward (fused W1|W3, lane-dense 128-wide intermediate) ----
    w13 = jnp.dot(h2, w13_ref[...], preferred_element_type=jnp.float32)  # (BS, 2*DFF)
    w1x = w13[:, :DFF]
    w3x = w13[:, DFF:]
    gate = w1x * jax.nn.sigmoid(w1x) * w3x
    ffn = jnp.dot(gate, w2_t_ref[...], preferred_element_type=jnp.float32)

    out_ref[...] = (y + ffn).astype(out_ref.dtype)           # residual 2


# ----------------------------- one-time param/table fusion -------------------
def prepare_params(raw_params):
    """Hoisted out of the per-call path: fuse weights, build RoPE tables and
    all compile-time-constant masks ONCE."""
    (g1, wq, wk, wv, wo, g2, w1, w2, w3) = raw_params

    # adjacent-pair swap permutation: (x @ P)[:, j] = x[:, j ^ 1]
    p_swap = jnp.eye(D, dtype=jnp.float32)[jnp.arange(D) ^ 1]

    wqkv = jnp.concatenate(
        [wq.T, wk.T, wv.T, wq.T @ p_swap, wk.T @ p_swap], axis=1)   # (D, 5D)
    w13 = jnp.concatenate([w1.T, w3.T], axis=1)                      # (D, 2*DFF)
    wo_t = wo.T
    w2_t = w2.T

    # RoPE tables for token_positions = arange(S), interleaved layout, per head
    pos = jnp.arange(S, dtype=jnp.float32)
    kk = jnp.arange(DK // 2, dtype=jnp.float32)
    theta_ik = pos[:, None] / jnp.power(THETA, 2.0 * kk / DK)       # (S, DK/2)
    cos_h = jnp.cos(theta_ik)
    sin_h = jnp.sin(theta_ik)
    cos_pair = jnp.stack([cos_h, cos_h], axis=-1).reshape(S, DK)
    sin_pair = jnp.stack([-sin_h, sin_h], axis=-1).reshape(S, DK)
    cos_bs = jnp.tile(jnp.tile(cos_pair, (1, H)), (B, 1))            # (BS, D)
    sins_bs = jnp.tile(jnp.tile(sin_pair, (1, H)), (B, 1))           # (BS, D)

    # constant masks for the block-diagonal attention
    # K_bd/V_bd rows ordered (head, batch, seq): row r -> head = r // (B*S)
    r_idx = jnp.arange(BHS)
    d_idx = jnp.arange(D)
    bd_mask = ((d_idx[None, :] // DK) == (r_idx[:, None] // BS)).astype(jnp.float32)
    seg_ones = ((r_idx[:, None] // S) == (r_idx[None, :] // S)).astype(jnp.float32)

    i_idx = jnp.arange(BS)
    b_i = i_idx // S
    q_i = i_idx % S
    b_j = (r_idx // S) % B
    k_j = r_idx % S
    same_batch = b_i[:, None] == b_j[None, :]
    causal = k_j[None, :] <= q_i[:, None]
    bias = jnp.where(same_batch & causal, 0.0, -jnp.inf).astype(jnp.float32)  # (BS, BHS)
    dfix = jnp.where(same_batch, 0.0, 1.0).astype(jnp.float32)                # (BS, BHS)

    return (g1.reshape(1, D), wqkv, cos_bs, sins_bs, wo_t,
            g2.reshape(1, D), w13, w2_t, bd_mask, seg_ones, bias, dfix)


# ----------------------------- wrapper ---------------------------------------
@jax.jit
def transformer_block_pallas(x, prepared):
    x_flat = x.reshape(BS, D)

    vmem = pl.BlockSpec(memory_space=pltpu.MemorySpace.VMEM)

    flops = 2 * (BS * D * 5 * D                      # fused QKV
                 + BS * D * BHS                      # scores
                 + BS * BHS * BHS                    # segmented denominator
                 + BS * BHS * D                      # P @ V_bd
                 + BS * D * D                        # Wo
                 + BS * D * 2 * DFF                  # W1|W3
                 + BS * DFF * D)                     # W2
    transcendentals = BS * BHS + BS * DFF + 2 * BS + BS * BHS  # exp, sigmoid, rsqrt, rcp
    bytes_accessed = 4 * (2 * BS * D + 2 * D + D * 5 * D + 2 * BS * D
                          + D * D + D * 2 * DFF + DFF * D
                          + BHS * D + BHS * BHS + 2 * BS * BHS)

    out = pl.pallas_call(
        transformer_block_kernel,
        out_shape=jax.ShapeDtypeStruct((BS, D), jnp.float32),
        in_specs=[vmem] * 13,
        out_specs=vmem,
        cost_estimate=pl.CostEstimate(flops=flops,
                                      transcendentals=transcendentals,
                                      bytes_accessed=bytes_accessed),
    )(x_flat, *prepared)
    return out.reshape(B, S, D)


# ----------------------------- parameter init --------------------------------
def init_params(key):
    ks = jax.random.split(key, 7)
    std_attn = math.sqrt(2.0 / (DK * H + D))
    std_ff = math.sqrt(2.0 / (D + DFF))
    tn = lambda k, shape: jax.random.truncated_normal(k, -3.0, 3.0, shape, jnp.float32)

    wq = tn(ks[0], (D, D)) * std_attn
    wk = tn(ks[1], (D, D)) * std_attn
    wv = tn(ks[2], (D, D)) * std_attn
    wo = tn(ks[3], (D, D)) * std_attn
    w1 = tn(ks[4], (DFF, D)) * std_ff
    w2 = tn(ks[5], (D, DFF)) * std_ff
    w3 = tn(ks[6], (DFF, D)) * std_ff
    g1 = jnp.ones((D,), jnp.float32)
    g2 = jnp.ones((D,), jnp.float32)
    return (g1, wq, wk, wv, wo, g2, w1, w2, w3)


# ----------------------------- pure-JAX reference ----------------------------
def reference(x, raw_params):
    (g1, wq, wk, wv, wo, g2, w1, w2, w3) = raw_params

    def rmsnorm(t, g):
        denom = jnp.sqrt(jnp.mean(t * t, axis=-1, keepdims=True) + EPS)
        return t * g / denom

    def rope(xh):  # (B, H, S, DK)
        pos = jnp.arange(S, dtype=jnp.float32)
        kk = jnp.arange(DK // 2, dtype=jnp.float32)
        ang = pos[:, None] / jnp.power(THETA, 2.0 * kk / DK)
        c, s = jnp.cos(ang), jnp.sin(ang)
        x0, x1 = xh[..., 0::2], xh[..., 1::2]
        r0 = c * x0 - s * x1
        r1 = s * x0 + c * x1
        return jnp.stack([r0, r1], axis=-1).reshape(xh.shape)

    h = rmsnorm(x, g1)
    q = h @ wq.T
    k = h @ wk.T
    v = h @ wv.T
    split = lambda t: t.reshape(B, S, H, DK).transpose(0, 2, 1, 3)
    qh, kh, vh = rope(split(q)), rope(split(k)), split(v)
    scores = jnp.einsum("bhqd,bhkd->bhqk", qh, kh) / math.sqrt(DK)
    mask = jnp.tril(jnp.ones((S, S), bool))
    scores = jnp.where(mask, scores, -jnp.inf)
    p = jax.nn.softmax(scores, axis=-1)
    attn = jnp.einsum("bhqk,bhkd->bhqd", p, vh)
    attn = attn.transpose(0, 2, 1, 3).reshape(B, S, D)
    y = x + attn @ wo.T
    h2 = rmsnorm(y, g2)
    w1x = h2 @ w1.T
    w3x = h2 @ w3.T
    ffn = (w1x * jax.nn.sigmoid(w1x) * w3x) @ w2.T
    return y + ffn


# ----------------------------- main -------------------------------------------
if __name__ == "__main__":
    key = jax.random.PRNGKey(0)
    kx, kp = jax.random.split(key)
    x = jax.random.normal(kx, (B, S, D), jnp.float32)
    raw_params = init_params(kp)

    # One-time fusion of weights / tables / masks (NOT on the per-call path).
    prepared = prepare_params(raw_params)
    prepared = jax.block_until_ready(prepared)

    out = transformer_block_pallas(x, prepared)
    out = jax.block_until_ready(out)

    ref = reference(x, raw_params)
    assert out.shape == (B, S, D)
    assert jnp.allclose(out, ref, atol=1e-4, rtol=1e-4), (
        f"max abs diff {jnp.max(jnp.abs(out - ref))}")
    print("KERNEL_OK")
</pallas_src>

<mosaic_0001>
module attributes {stable_mosaic.version = 11 : i64} {
  func.func @transformer_block_kernel(%arg0: memref<16x32xf32, #tpu.memory_space<vmem>>, %arg1: memref<1x32xf32, #tpu.memory_space<vmem>>, %arg2: memref<32x160xf32, #tpu.memory_space<vmem>>, %arg3: memref<16x32xf32, #tpu.memory_space<vmem>>, %arg4: memref<16x32xf32, #tpu.memory_space<vmem>>, %arg5: memref<32x32xf32, #tpu.memory_space<vmem>>, %arg6: memref<1x32xf32, #tpu.memory_space<vmem>>, %arg7: memref<32x128xf32, #tpu.memory_space<vmem>>, %arg8: memref<64x32xf32, #tpu.memory_space<vmem>>, %arg9: memref<64x32xf32, #tpu.memory_space<vmem>>, %arg10: memref<64x64xf32, #tpu.memory_space<vmem>>, %arg11: memref<16x64xf32, #tpu.memory_space<vmem>>, %arg12: memref<16x64xf32, #tpu.memory_space<vmem>>, %arg13: memref<16x32xf32, #tpu.memory_space<vmem>>) attributes {dimension_semantics = [], scalar_prefetch = 0 : i64, scratch_operands = 0 : i64, tpu.core_type = #tpu.core_type<tc>} {
    %c0 = arith.constant 0 : index
    %c0_0 = arith.constant 0 : index
    %0 = vector.load %arg0[%c0, %c0_0] : memref<16x32xf32, #tpu.memory_space<vmem>>, vector<16x32xf32>
    %1 = arith.mulf %0, %0 : vector<16x32xf32>
    %cst = arith.constant dense<0.000000e+00> : vector<16xf32>
    %2 = vector.multi_reduction <add>, %1, %cst [1] : vector<16x32xf32> to vector<16xf32>
    %3 = vector.shape_cast %2 : vector<16xf32> to vector<16x1xf32>
    %cst_1 = arith.constant 3.200000e+01 : f32
    %4 = vector.broadcast %cst_1 : f32 to vector<16x1xf32>
    %5 = arith.divf %3, %4 : vector<16x1xf32>
    %cst_2 = arith.constant 9.99999974E-6 : f32
    %6 = vector.broadcast %cst_2 : f32 to vector<16x1xf32>
    %7 = arith.addf %5, %6 : vector<16x1xf32>
    %8 = math.rsqrt %7 : vector<16x1xf32>
    %c0_3 = arith.constant 0 : index
    %c0_4 = arith.constant 0 : index
    %9 = vector.load %arg1[%c0_3, %c0_4] : memref<1x32xf32, #tpu.memory_space<vmem>>, vector<1x32xf32>
    %10 = vector.broadcast %9 : vector<1x32xf32> to vector<16x32xf32>
    %11 = arith.mulf %0, %10 : vector<16x32xf32>
    %12 = vector.broadcast %8 : vector<16x1xf32> to vector<16x32xf32>
    %13 = arith.mulf %11, %12 : vector<16x32xf32>
    %c0_5 = arith.constant 0 : index
    %c0_6 = arith.constant 0 : index
    %14 = vector.load %arg2[%c0_5, %c0_6] : memref<32x160xf32, #tpu.memory_space<vmem>>, vector<32x160xf32>
    %cst_7 = arith.constant dense<0.000000e+00> : vector<16x160xf32>
    %15 = tpu.matmul %13, %14, %cst_7 {dimension_numbers = #tpu.dot_dimension_numbers<[1], [0], [0], [1], [0, 0, 1, 1], [], []>} : vector<16x32xf32>, vector<32x160xf32>, vector<16x160xf32> -> vector<16x160xf32>
    %16 = vector.extract_strided_slice %15 {offsets = [0, 0], sizes = [16, 32], strides = [1, 1]} : vector<16x160xf32> to vector<16x32xf32>
    %17 = vector.extract_strided_slice %15 {offsets = [0, 32], sizes = [16, 32], strides = [1, 1]} : vector<16x160xf32> to vector<16x32xf32>
    %18 = vector.extract_strided_slice %15 {offsets = [0, 64], sizes = [16, 32], strides = [1, 1]} : vector<16x160xf32> to vector<16x32xf32>
    %19 = vector.extract_strided_slice %15 {offsets = [0, 96], sizes = [16, 32], strides = [1, 1]} : vector<16x160xf32> to vector<16x32xf32>
    %20 = vector.extract_strided_slice %15 {offsets = [0, 128], sizes = [16, 32], strides = [1, 1]} : vector<16x160xf32> to vector<16x32xf32>
    %c0_8 = arith.constant 0 : index
    %c0_9 = arith.constant 0 : index
    %21 = vector.load %arg3[%c0_8, %c0_9] : memref<16x32xf32, #tpu.memory_space<vmem>>, vector<16x32xf32>
    %c0_10 = arith.constant 0 : index
    %c0_11 = arith.constant 0 : index
    %22 = vector.load %arg4[%c0_10, %c0_11] : memref<16x32xf32, #tpu.memory_space<vmem>>, vector<16x32xf32>
    %23 = arith.mulf %16, %21 : vector<16x32xf32>
    %24 = arith.mulf %19, %22 : vector<16x32xf32>
    %25 = arith.addf %23, %24 : vector<16x32xf32>
    %26 = arith.mulf %17, %21 : vector<16x32xf32>
    %27 = arith.mulf %20, %22 : vector<16x32xf32>
    %28 = arith.addf %26, %27 : vector<16x32xf32>
    %c0_12 = arith.constant 0 : index
    %c0_13 = arith.constant 0 : index
    %29 = vector.load %arg9[%c0_12, %c0_13] : memref<64x32xf32, #tpu.memory_space<vmem>>, vector<64x32xf32>
    %30 = tpu.concatenate %28, %28, %28, %28 in 0 : vector<16x32xf32>, vector<16x32xf32>, vector<16x32xf32>, vector<16x32xf32> -> vector<64x32xf32>
    %31 = arith.mulf %30, %29 : vector<64x32xf32>
    %32 = tpu.concatenate %18, %18, %18, %18 in 0 : vector<16x32xf32>, vector<16x32xf32>, vector<16x32xf32>, vector<16x32xf32> -> vector<64x32xf32>
    %33 = arith.mulf %32, %29 : vector<64x32xf32>
    %cst_14 = arith.constant dense<0.000000e+00> : vector<16x64xf32>
    %34 = tpu.matmul %25, %31, %cst_14 {dimension_numbers = #tpu.dot_dimension_numbers<[1], [1], [0], [0], [0, 0, 1, 0], [], []>} : vector<16x32xf32>, vector<64x32xf32>, vector<16x64xf32> -> vector<16x64xf32>
    %cst_15 = arith.constant 0.353553385 : f32
    %35 = vector.broadcast %cst_15 : f32 to vector<16x64xf32>
    %36 = arith.mulf %34, %35 : vector<16x64xf32>
    %c0_16 = arith.constant 0 : index
    %c0_17 = arith.constant 0 : index
    %37 = vector.load %arg11[%c0_16, %c0_17] : memref<16x64xf32, #tpu.memory_space<vmem>>, vector<16x64xf32>
    %38 = arith.addf %36, %37 : vector<16x64xf32>
    %cst_18 = arith.constant dense<0xFF800000> : vector<16xf32>
    %39 = vector.multi_reduction <maximumf>, %38, %cst_18 [1] : vector<16x64xf32> to vector<16xf32>
    %40 = vector.shape_cast %39 : vector<16xf32> to vector<16x1xf32>
    %41 = vector.broadcast %40 : vector<16x1xf32> to vector<16x64xf32>
    %42 = arith.subf %38, %41 : vector<16x64xf32>
    %43 = math.exp %42 : vector<16x64xf32>
    %c0_19 = arith.constant 0 : index
    %c0_20 = arith.constant 0 : index
    %44 = vector.load %arg10[%c0_19, %c0_20] : memref<64x64xf32, #tpu.memory_space<vmem>>, vector<64x64xf32>
    %cst_21 = arith.constant dense<0.000000e+00> : vector<16x64xf32>
    %45 = tpu.matmul %43, %44, %cst_21 {dimension_numbers = #tpu.dot_dimension_numbers<[1], [0], [0], [1], [0, 0, 1, 1], [], []>} : vector<16x64xf32>, vector<64x64xf32>, vector<16x64xf32> -> vector<16x64xf32>
    %c0_22 = arith.constant 0 : index
    %c0_23 = arith.constant 0 : index
    %46 = vector.load %arg12[%c0_22, %c0_23] : memref<16x64xf32, #tpu.memory_space<vmem>>, vector<16x64xf32>
    %47 = arith.addf %45, %46 : vector<16x64xf32>
    %48 = tpu.reciprocal %47 {approx = true} : vector<16x64xf32> -> vector<16x64xf32>
    %49 = arith.mulf %47, %48 : vector<16x64xf32>
    %cst_24 = arith.constant 2.000000e+00 : f32
    %50 = vector.broadcast %cst_24 : f32 to vector<16x64xf32>
    %51 = arith.subf %50, %49 : vector<16x64xf32>
    %52 = arith.mulf %48, %51 : vector<16x64xf32>
    %53 = arith.mulf %43, %52 : vector<16x64xf32>
    %cst_25 = arith.constant dense<0.000000e+00> : vector<16x32xf32>
    %54 = tpu.matmul %53, %33, %cst_25 {dimension_numbers = #tpu.dot_dimension_numbers<[1], [0], [0], [1], [0, 0, 1, 1], [], []>} : vector<16x64xf32>, vector<64x32xf32>, vector<16x32xf32> -> vector<16x32xf32>
    %c0_26 = arith.constant 0 : index
    %c0_27 = arith.constant 0 : index
    %55 = vector.load %arg5[%c0_26, %c0_27] : memref<32x32xf32, #tpu.memory_space<vmem>>, vector<32x32xf32>
    %cst_28 = arith.constant dense<0.000000e+00> : vector<16x32xf32>
    %56 = tpu.matmul %54, %55, %cst_28 {dimension_numbers = #tpu.dot_dimension_numbers<[1], [0], [0], [1], [0, 0, 1, 1], [], []>} : vector<16x32xf32>, vector<32x32xf32>, vector<16x32xf32> -> vector<16x32xf32>
    %57 = arith.addf %0, %56 : vector<16x32xf32>
    %58 = arith.mulf %57, %57 : vector<16x32xf32>
    %cst_29 = arith.constant dense<0.000000e+00> : vector<16xf32>
    %59 = vector.multi_reduction <add>, %58, %cst_29 [1] : vector<16x32xf32> to vector<16xf32>
    %60 = vector.shape_cast %59 : vector<16xf32> to vector<16x1xf32>
    %cst_30 = arith.constant 3.200000e+01 : f32
    %61 = vector.broadcast %cst_30 : f32 to vector<16x1xf32>
    %62 = arith.divf %60, %61 : vector<16x1xf32>
    %cst_31 = arith.constant 9.99999974E-6 : f32
    %63 = vector.broadcast %cst_31 : f32 to vector<16x1xf32>
    %64 = arith.addf %62, %63 : vector<16x1xf32>
    %65 = math.rsqrt %64 : vector<16x1xf32>
    %c0_32 = arith.constant 0 : index
    %c0_33 = arith.constant 0 : index
    %66 = vector.load %arg6[%c0_32, %c0_33] : memref<1x32xf32, #tpu.memory_space<vmem>>, vector<1x32xf32>
    %67 = vector.broadcast %66 : vector<1x32xf32> to vector<16x32xf32>
    %68 = arith.mulf %57, %67 : vector<16x32xf32>
    %69 = vector.broadcast %65 : vector<16x1xf32> to vector<16x32xf32>
    %70 = arith.mulf %68, %69 : vector<16x32xf32>
    %c0_34 = arith.constant 0 : index
    %c0_35 = arith.constant 0 : index
    %71 = vector.load %arg7[%c0_34, %c0_35] : memref<32x128xf32, #tpu.memory_space<vmem>>, vector<32x128xf32>
    %cst_36 = arith.constant dense<0.000000e+00> : vector<16x128xf32>
    %72 = tpu.matmul %70, %71, %cst_36 {dimension_numbers = #tpu.dot_dimension_numbers<[1], [0], [0], [1], [0, 0, 1, 1], [], []>} : vector<16x32xf32>, vector<32x128xf32>, vector<16x128xf32> -> vector<16x128xf32>
    %73 = vector.extract_strided_slice %72 {offsets = [0, 0], sizes = [16, 64], strides = [1, 1]} : vector<16x128xf32> to vector<16x64xf32>
    %74 = vector.extract_strided_slice %72 {offsets = [0, 64], sizes = [16, 64], strides = [1, 1]} : vector<16x128xf32> to vector<16x64xf32>
    %75 = arith.negf %73 : vector<16x64xf32>
    %76 = math.exp %75 : vector<16x64xf32>
    %cst_37 = arith.constant 1.000000e+00 : f32
    %77 = vector.broadcast %cst_37 : f32 to vector<16x64xf32>
    %78 = arith.addf %77, %76 : vector<16x64xf32>
    %79 = arith.divf %77, %78 : vector<16x64xf32>
    %80 = arith.mulf %73, %79 : vector<16x64xf32>
    %81 = arith.mulf %80, %74 : vector<16x64xf32>
    %c0_38 = arith.constant 0 : index
    %c0_39 = arith.constant 0 : index
    %82 = vector.load %arg8[%c0_38, %c0_39] : memref<64x32xf32, #tpu.memory_space<vmem>>, vector<64x32xf32>
    %cst_40 = arith.constant dense<0.000000e+00> : vector<16x32xf32>
    %83 = tpu.matmul %81, %82, %cst_40 {dimension_numbers = #tpu.dot_dimension_numbers<[1], [0], [0], [1], [0, 0, 1, 1], [], []>} : vector<16x64xf32>, vector<64x32xf32>, vector<16x32xf32> -> vector<16x32xf32>
    %84 = arith.addf %57, %83 : vector<16x32xf32>
    %c0_41 = arith.constant 0 : index
    %c0_42 = arith.constant 0 : index
    %85 = vector.load %arg13[%c0_41, %c0_42] : memref<16x32xf32, #tpu.memory_space<vmem>>, vector<16x32xf32>
    tpu.vector_store %arg13[%c0_41, %c0_42], %84 {strides = array<i32>} : memref<16x32xf32, #tpu.memory_space<vmem>>, vector<16x32xf32>,
    return
  }
}

</mosaic_0001>

<bundles_post_ra>
// kernel: transformer_block_pallas.1
= control target key start
LH: loop header
LB: loop body
LE: loop exit
PB: predicated region body
PF: predicated region fallthrough
CT: control target
= control target key end

     0   :  { %18 = vsyncpa [#allocation3], 0  ;;  %s1498_s0 = inlined_call_operand.hbm [shape: f32[16,32], index: 0, kind: input, shape index: {}]   ;;  %s1499_s1 = inlined_call_operand.hbm [shape: f32[1,32], index: 1, kind: input, shape index: {}]   ;;  %s1500_s2 = inlined_call_operand.vmem [shape: f32[32,160], index: 2, kind: input, shape index: {}]   ;;  %s1501_s3 = inlined_call_operand.hbm [shape: f32[16,32], index: 3, kind: input, shape index: {}]   ;;  %s1502_s4 = inlined_call_operand.hbm [shape: f32[16,32], index: 4, kind: input, shape index: {}]   ;;  %s1503_s5 = inlined_call_operand.vmem [shape: f32[32,32], index: 5, kind: input, shape index: {}]   ;;  %s1504_s6 = inlined_call_operand.vmem [shape: f32[1,32], index: 6, kind: input, shape index: {}]   ;;  %s1505_s7 = inlined_call_operand.hbm [shape: f32[32,128], index: 7, kind: input, shape index: {}]   ;;  %s1506_s8 = inlined_call_operand.vmem [shape: f32[64,32], index: 8, kind: input, shape index: {}]   ;;  %s1507_s9 = inlined_call_operand.vmem [shape: f32[64,32], index: 9, kind: input, shape index: {}]   ;;  %s1508_s10 = inlined_call_operand.vmem [shape: f32[64,64], index: 10, kind: input, shape index: {}]   ;;  %s1509_s11 = inlined_call_operand.hbm [shape: f32[16,64], index: 11, kind: input, shape index: {}]   ;;  %s1510_s12 = inlined_call_operand.hbm [shape: f32[16,64], index: 12, kind: input, shape index: {}]   ;;  %s1511_s13 = inlined_call_operand.hbm [shape: f32[16,32], index: 13, kind: output, shape index: {}]  }
   0x1   :  { %19 = vsyncpa [#allocation6], 0 }
   0x2   :  { %20 = vsyncpa [#allocation9], 0 }
   0x3   :  { %21 = vsyncpa [#allocation12], 0  ;;  %s41_s27 = sshll.u32 %s1499_s1, 4  ;;  %s42_s27 = int_to_ptr.hbm [resolvable:$true] %s41_s27 }
   0x4   :  { %22 = vsyncpa [#allocation4], 0  ;;  %s1107_s28 = smov [#allocation5]   ;;  %s66_s15 = sshll.u32 %s1502_s4, 4  ;;  %s67_s15 = int_to_ptr.hbm [resolvable:$true] %s66_s15 }
   0x5   :  { %s43_s29 = sshll.u32 %s1107_s28, 4  ;;  %s1108_s16 = smov [#allocation8]   ;;  %s44_s29 = int_to_ptr.vmem [resolvable:$true] %s43_s29 }
   0x6   :  { %46 = dma.hbm_to_vmem [thread:$0]  %s42_s27, 16, %s44_s29, [#allocation6]  }
   0x7   :  { %s68_s17 = sshll.u32 %s1108_s16, 4  ;;  %s102_s20 = sshll.u32 %s1509_s11, 4  ;;  %s69_s17 = int_to_ptr.vmem [resolvable:$true] %s68_s17  ;;  %s103_s20 = int_to_ptr.hbm [resolvable:$true] %s102_s20 }
   0x8   :  { %s1109_s1 = smov 128   ;;  %s1110_s21 = smov 8  }
   0x9   :  { %74 = dma.hbm_to_vmem [thread:$0]  %s67_s15, 256, %s69_s17, [#allocation9], %s1109_s1, %s1109_s1, %s1110_s21  }
   0xa   :  { %s27_s24 = sshll.u32 %s1498_s0, 4  ;;  %s1111_s4 = smov [#allocation11]   ;;  %s28_s24 = int_to_ptr.hbm [resolvable:$true] %s27_s24 }
   0xb   :  { %s104_s25 = sshll.u32 %s1111_s4, 4  ;;  %s1112_s11 = smov [#allocation2]   ;;  %s105_s25 = int_to_ptr.vmem [resolvable:$true] %s104_s25 }
   0xc   :  { %110 = dma.hbm_to_vmem [thread:$0]  %s103_s20, 256, %s105_s25, [#allocation12], %s1109_s1, %s1109_s1, %s1110_s21  }
   0xd   :  { %s29_s26 = sshll.u32 %s1112_s11, 4  ;;  %s53_s29 = sshll.u32 %s1501_s3, 4  ;;  %s30_s26 = int_to_ptr.vmem [resolvable:$true] %s29_s26  ;;  %s54_s29 = int_to_ptr.hbm [resolvable:$true] %s53_s29 }
   0xe   :  { %35 = dma.hbm_to_vmem [thread:$0]  %s28_s24, 256, %s30_s26, [#allocation3], %s1109_s1, %s1109_s1, %s1110_s21  }
   0xf   :  { %s83_s14 = sshll.u32 %s1505_s7, 4  ;;  %s1113_s15 = smov [#allocation7]   ;;  %s84_s14 = int_to_ptr.hbm [resolvable:$true] %s83_s14 }
  0x10   :  { %s55_s16 = sshll.u32 %s1113_s15, 4  ;;  %s1114_s17 = smov [#allocation10]   ;;  %s56_s16 = int_to_ptr.vmem [resolvable:$true] %s55_s16 }
  0x11   :  { %61 = dma.hbm_to_vmem [thread:$0]  %s54_s29, 256, %s56_s16, [#allocation6], %s1109_s1, %s1109_s1, %s1110_s21  }
  0x12   :  { %s85_s3 = sshll.u32 %s1114_s17, 4  ;;  %s115_s20 = sshll.u32 %s1510_s12, 4  ;;  %s86_s3 = int_to_ptr.vmem [resolvable:$true] %s85_s3  ;;  %s116_s20 = int_to_ptr.hbm [resolvable:$true] %s115_s20 }
  0x13   :  { %91 = dma.hbm_to_vmem [thread:$0]  %s84_s14, 512, %s86_s3, [#allocation9], %s1109_s1, %s1109_s1, %s1110_s21  }
  0x14   :  { %s1115_s7 = smov [#allocation13]  }
  0x15   :  { %s117_s22 = sshll.u32 %s1115_s7, 4  ;;  %s118_s22 = int_to_ptr.vmem [resolvable:$true] %s117_s22 }
  0x16   :  { %123 = dma.hbm_to_vmem [thread:$0]  %s116_s20, 256, %s118_s22, [#allocation12], %s1109_s1, %s1109_s1, %s1110_s21  }
  0x17   :  { %1097 = dma.done.wait [#allocation3], 256  }
  0x18   :  { %1098 = vsyncadd [#allocation3], 4294967040 }
  0x19   :  { %1099 = dma.done.wait [#allocation6], 272  }
  0x1a   :  { %1100 = vsyncadd [#allocation6], 4294967024 }
  0x1b   :  { %1101 = dma.done.wait [#allocation9], 768  }
  0x1c   :  { %1102 = vsyncadd [#allocation9], 4294966528 }
  0x1d   :  { %1103 = dma.done.wait [#allocation12], 512  }
  0x1e   :  { %1104 = vsyncadd [#allocation12], 4294966784  ;;  %v1230_v0 = vld [vmem:[#allocation2] sm:$0xff]  ;;  %vm156_vm0 = vcmask 261120   ;;  %v1234_v2 = vld [vmem:[#allocation2 + $0x8] sm:$0xff]  ;;  %v1116_v6 = vmov 32.0  }
  0x1f   :  { %v154_v1 = vmul.f32 %v1230_v0, %v1230_v0  ;;  %v155_v4 = vmul.f32 %v1234_v2, %v1234_v2  ;;  %879 = vrcp.f32 %v1116_v6  ;;  %v208_v9 = vld [vmem:[%s1500_s2 + $0x30] sm:$0xff]  ;;  %v209_v10 = vld [vmem:[%s1500_s2 + $0x38] sm:$0xff]  ;;  %v206_v12 = vld [vmem:[%s1500_s2 + $0x20] sm:$0xff]  ;;  %s1117_s3 = smov 32   ;;  %s1118_s24 = smov 96   ;;  %vm465_vm8 = vcmask 523264  }
  0x20   :  { %228 = vmatpush.msra.mxu0 %v208_v9  ;;  %251 = vmatpush.msra.mxu1 %v209_v10  ;;  %v207_v13 = vld [vmem:[%s1500_s2 + $0x28] sm:$0xff]  ;;  %v204_v14 = vld [vmem:[%s1500_s2 + $0x10] sm:$0xff]  ;;  %v205_v15 = vld [vmem:[%s1500_s2 + $0x18] sm:$0xff]  ;;  %s793_s11 = sshll.u32 %s1511_s13, 4  ;;  %s794_s11 = int_to_ptr.hbm [resolvable:$true] %s793_s11 }
  0x21   :  { %v157_v3 = vsel %vm156_vm0, %v154_v1, 0.0  ;;  %v160_v5 = vsel %vm156_vm0, %v155_v4, 0.0  ;;  %v202_v17 = vld [vmem:[%s1500_s2] sm:$0xff]  ;;  %v203_v18 = vld [vmem:[%s1500_s2 + $0x8] sm:$0xff]  ;;  %v1264_v20 = vld [vmem:[#allocation7] sm:$0xff] }
  0x22   :  { %158 = vadd.xlane.f32.xlu0 %v157_v3  ;;  %229 = vmatpush.msra.mxu0 %v206_v12  ;;  %v1274_v24 = vld [vmem:[%s1507_s9 + $0x38] sm:$0xff]  ;;  %v1285_v28 = vld [vmem:[%s1507_s9 + $0x28] sm:$0xff]  ;;  %v877_v34 = vld [vmem:[#allocation5] ss:$0 sm:$0xff] }
  0x23   :  { %252 = vmatpush.msra.mxu1 %v207_v13  ;;  %290 = vrot.lane.b32.xlu2 %v1264_v20, %s1117_s3  ;;  %v1276_v25 = vld [vmem:[#allocation7 + $0x8] sm:$0xff]  ;;  %v198_v39 = vmul.f32 %v877_v34, %v1230_v0  ;;  %v1301_v46 = vld [vmem:[%s1507_s9 + $0x8] sm:$0xff]  ;;  %v199_v48 = vmul.f32 %v877_v34, %v1234_v2  ;;  %v316_v59 = vld [vmem:[%s1507_s9 + $0x30] sm:$0xff] }
  0x24   :  { %230 = vmatpush.msra.mxu0 %v204_v14  ;;  %292 = vrot.lane.b32.xlu1 %v1276_v25, %s1117_s3  ;;  %v1293_v36 = vld [vmem:[%s1507_s9 + $0x18] sm:$0xff]  ;;  %v265_v52 = vld [vmem:[#allocation8 + $0x8] sm:$0xff]  ;;  %v264_v53 = vld [vmem:[#allocation8] sm:$0xff] }
  0x25   :  { %v880_v7 = vpop.eup %879  ;;  %253 = vmatpush.msra.mxu1 %v205_v15  ;;  %v310_v57 = vld [vmem:[%s1507_s9] sm:$0xff]  ;;  %v1328_v61 = vld [vmem:[%s1507_s9 + $0x10] sm:$0xff] }
  0x26   :  { %v164_v8 = vmul.f32 32.0, %v880_v7  ;;  %231 = vmatpush.msra.mxu0 %v202_v17  ;;  %vm168_vm1 = vweird.f32 %v880_v7  ;;  %v314_v60 = vld [vmem:[%s1507_s9 + $0x20] sm:$0xff]  ;;  %s1119_s9 = smov 64  }
  0x27   :  { %254 = vmatpush.msra.mxu1 %v203_v18 }
  0x28   :  { %v165_v11 = vsub.f32 1.0, %v164_v8 }
  0x2a   :  { %161 = vadd.xlane.f32.xlu0 %v160_v5  ;;  %v166_v16 = vmul.f32 %v880_v7, %v165_v11 }
  0x2b   :  { %340 = vrot.lane.b32.xlu2 %v1274_v24, %s1117_s3 }
  0x2c   :  { %v167_v19 = vadd.f32 %v880_v7, %v166_v16 }
  0x2e   :  { %v1268_v21 = vsel %vm168_vm1, %v880_v7, %v167_v19 }
  0x33   :  { %336 = vrot.lane.b32.xlu2 %v1285_v28, %s1117_s3 }
  0x3b   :  { %332 = vrot.lane.b32.xlu2 %v1293_v36, %s1117_s3 }
  0x43   :  { %328 = vrot.lane.b32.xlu2 %v1301_v46, %s1117_s3 }
  0x4b   :  { %272 = vrot.lane.b32.xlu2 %v265_v52, %s1118_s24 }
  0x7d   :  { %v291_v62 = vpop.permute.xlu2 %290 }
  0x85   :  { %v341_v1 = vpop.permute.xlu2 %340 }
  0x8d   :  { %v337_v6 = vpop.permute.xlu2 %336 }
  0x95   :  { %v159_v22 = vpop.xlane.xlu0 %158  ;;  %v333_v16 = vpop.permute.xlu2 %332 }
  0x96   :  { %v170_v23 = vmul.f32 %v1268_v21, %v159_v22  ;;  %v293_v3 = vpop.permute.xlu1 %292 }
  0x98   :  { %v172_v26 = vadd.f32 1e-05, %v170_v23 }
  0x9a   :  { %881 = vrsqrt.f32 %v172_v26  ;;  %vm180_vm3 = vweird.f32 %v172_v26 }
  0x9d   :  { %v162_v27 = vpop.xlane.xlu0 %161  ;;  %v329_v22 = vpop.permute.xlu2 %328 }
  0x9e   :  { %v171_v29 = vmul.f32 %v1268_v21, %v162_v27 }
  0xa0   :  { %v882_v30 = vpop.eup %881  ;;  %v173_v31 = vadd.f32 1e-05, %v171_v29 }
  0xa1   :  { %v175_v32 = vmul.f32 %v882_v30, %v172_v26  ;;  %vm181_vm2 = vweird.f32 %v882_v30 }
  0xa2   :  { %883 = vrsqrt.f32 %v173_v31  ;;  %vm182_vm4 = vmor %vm180_vm3, %vm181_vm2  ;;  %vm190_vm6 = vweird.f32 %v173_v31 }
  0xa3   :  { %v176_v33 = vmul.f32 %v882_v30, %v175_v32 }
  0xa5   :  { %v177_v35 = vmul.f32 0.5, %v176_v33 }
  0xa7   :  { %v178_v37 = vsub.f32 1.5, %v177_v35 }
  0xa8   :  { %v884_v38 = vpop.eup %883 }
  0xa9   :  { %v185_v40 = vmul.f32 %v884_v38, %v173_v31  ;;  %v179_v41 = vmul.f32 %v882_v30, %v178_v37  ;;  %vm191_vm5 = vweird.f32 %v884_v38  ;;  %v273_v31 = vpop.permute.xlu2 %272 }
  0xaa   :  { %vm192_vm7 = vmor %vm190_vm6, %vm191_vm5 }
  0xab   :  { %v186_v42 = vmul.f32 %v884_v38, %v185_v40  ;;  %v183_v43 = vsel %vm182_vm4, %v882_v30, %v179_v41 }
  0xac   :  { %v200_v44 = vmul.f32 %v198_v39, %v183_v43 }
  0xad   :  { %v187_v45 = vmul.f32 0.5, %v186_v42 }
  0xae   :  { %809 = vmatmul.msk.f32.vlgmr.msra.gmra.mxu0 %vm156_vm0, %v200_v44  ;;  %811 = vmatmul.msk.f32.vlgmr.msra.gmra.mxu1 %vm156_vm0, %v200_v44 }
  0xaf   :  { %v188_v47 = vsub.f32 1.5, %v187_v45 }
  0xb1   :  { %v189_v49 = vmul.f32 %v884_v38, %v188_v47 }
  0xb3   :  { %v193_v50 = vsel %vm192_vm7, %v884_v38, %v189_v49 }
  0xb4   :  { %v201_v51 = vmul.f32 %v199_v48, %v193_v50 }
  0xb6   :  { %810 = vmatmul.msk.f32.gmra.mxu0 %vm156_vm0, %v201_v51  ;;  %812 = vmatmul.msk.f32.gmra.mxu1 %vm156_vm0, %v201_v51 }
 0x12b   :  { %v256_v54 = vpop.f32.mrf.mxu1  ;;  %v1333_v63 = vpop.f32.mrf.mxu0 }
 0x12c   :  { %v298_v55 = vmul.f32 %v264_v53, %v256_v54  ;;  %v296_v12 = vmul.f32 %v291_v62, %v1333_v63  ;;  %v266_v41 = vmul.f32 %v1264_v20, %v1333_v63 }
 0x12e   :  { %302 = vrot.lane.b32.xlu0 %v298_v55, %s1117_s3 }
 0x133   :  { %v259_v56 = vpop.f32.mrf.mxu1  ;;  %v1335_v4 = vpop.f32.mrf.mxu0 }
 0x134   :  { %v299_v58 = vmul.f32 %v265_v52, %v259_v56  ;;  %v297_v5 = vmul.f32 %v293_v3, %v1335_v4  ;;  %v277_v34 = vmul.f32 %v273_v31, %v1335_v4  ;;  %v267_v45 = vmul.f32 %v1276_v25, %v1335_v4 }
 0x136   :  { %326 = vrot.lane.b32.xlu0 %v310_v57, %s1117_s3  ;;  %304 = vrot.lane.b32.xlu1 %v299_v58, %s1117_s3 }
 0x13e   :  { %338 = vrot.lane.b32.xlu1 %v316_v59, %s1117_s3 }
 0x146   :  { %334 = vrot.lane.b32.xlu1 %v314_v60, %s1117_s3 }
 0x14e   :  { %330 = vrot.lane.b32.xlu1 %v1328_v61, %s1117_s3 }
 0x156   :  { %270 = vrot.lane.b32.xlu1 %v264_v53, %s1118_s24 }
 0x1a0   :  { %v303_v11 = vpop.permute.xlu0 %302 }
 0x1a1   :  { %v308_v13 = vadd.f32 %v303_v11, %v296_v12 }
 0x1a8   :  { %v305_v7 = vpop.permute.xlu1 %304  ;;  %v327_v23 = vpop.permute.xlu0 %326 }
 0x1a9   :  { %v309_v8 = vadd.f32 %v305_v7, %v297_v5  ;;  %v350_v30 = vmul.f32 %v327_v23, %v308_v13  ;;  %v485_v7 = vld [vmem:[%s1508_s10 + $0x38] sm:$0xff] }
 0x1aa   :  { %502 = vmatpush.msra.mxu3 %v485_v7 }
 0x1ab   :  { %v357_v9 = vmul.f32 %v341_v1, %v309_v8  ;;  %v355_v10 = vmul.f32 %v337_v6, %v309_v8  ;;  %v353_v19 = vmul.f32 %v333_v16, %v309_v8  ;;  %v351_v29 = vmul.f32 %v329_v22, %v309_v8  ;;  %v484_v8 = vld [vmem:[%s1508_s10 + $0x30] sm:$0xff]  ;;  %v478_v22 = vld [vmem:[%s1508_s10] sm:$0xff] }
 0x1ac   :  { %503 = vmatpush.msra.mxu3 %v484_v8 }
 0x1ad   :  { %412 = vrot.lane.b32.xlu0 %v357_v9, %s1118_s24  ;;  %408 = vrot.lane.b32.xlu2 %v355_v10, %s1118_s24  ;;  %v462_v10 = vld [vmem:[#allocation11 + $0x8] sm:$0xff] }
 0x1b0   :  { %v339_v14 = vpop.permute.xlu1 %338 }
 0x1b1   :  { %v356_v15 = vmul.f32 %v339_v14, %v308_v13 }
 0x1b3   :  { %410 = vrot.lane.b32.xlu1 %v356_v15, %s1118_s24 }
 0x1b8   :  { %v335_v17 = vpop.permute.xlu1 %334 }
 0x1b9   :  { %v354_v18 = vmul.f32 %v335_v17, %v308_v13  ;;  %v483_v17 = vld [vmem:[%s1508_s10 + $0x28] sm:$0xff] }
 0x1ba   :  { %504 = vmatpush.msra.mxu3 %v483_v17 }
 0x1bb   :  { %404 = vrot.lane.b32.xlu1 %v353_v19, %s1118_s24  ;;  %406 = vrot.lane.b32.xlu0 %v354_v18, %s1118_s24  ;;  %v482_v18 = vld [vmem:[%s1508_s10 + $0x20] sm:$0xff]  ;;  %v481_v19 = vld [vmem:[%s1508_s10 + $0x18] sm:$0xff] }
 0x1bc   :  { %505 = vmatpush.msra.mxu3 %v482_v18 }
 0x1be   :  { %506 = vmatpush.msra.mxu3 %v481_v19 }
 0x1c0   :  { %v331_v26 = vpop.permute.xlu1 %330 }
 0x1c1   :  { %v352_v27 = vmul.f32 %v331_v26, %v308_v13 }
 0x1c3   :  { %400 = vrot.lane.b32.xlu0 %v351_v29, %s1118_s24  ;;  %402 = vrot.lane.b32.xlu2 %v352_v27, %s1118_s24 }
 0x1c4   :  { %398 = vrot.lane.b32.xlu1 %v350_v30, %s1118_s24 }
 0x1c8   :  { %v271_v32 = vpop.permute.xlu1 %270 }
 0x1c9   :  { %v276_v33 = vmul.f32 %v271_v32, %v1333_v63 }
 0x1cb   :  { %282 = vrot.lane.b32.xlu0 %v277_v34, %s1117_s3  ;;  %280 = vrot.lane.b32.xlu2 %v276_v33, %s1117_s3 }
 0x1d3   :  { %372 = vrot.lane.b32.xlu0 %v1274_v24, %s1119_s9 }
 0x1db   :  { %370 = vrot.lane.b32.xlu0 %v316_v59, %s1119_s9 }
 0x1e3   :  { %368 = vrot.lane.b32.xlu0 %v1285_v28, %s1119_s9 }
 0x1eb   :  { %366 = vrot.lane.b32.xlu0 %v314_v60, %s1119_s9  ;;  %v461_v60 = vld [vmem:[#allocation11] sm:$0xff] }
 0x1f3   :  { %364 = vrot.lane.b32.xlu0 %v1293_v36, %s1119_s9 }
 0x1fb   :  { %358 = vrot.lane.b32.xlu0 %v310_v57, %s1119_s9 }
 0x207   :  { %v409_v38 = vpop.permute.xlu2 %408 }
 0x21d   :  { %v403_v39 = vpop.permute.xlu2 %402 }
 0x21f   :  { %v413_v35 = vpop.permute.xlu0 %412 }
 0x220   :  { %813 = vmatpush.xpose.msk.msra.mxu2 %vm156_vm0, %v413_v35 }
 0x225   :  { %v411_v37 = vpop.permute.xlu1 %410  ;;  %v281_v36 = vpop.permute.xlu2 %280 }
 0x226   :  { %814 = vmatpush.xpose.msk.msra.mxu2 %vm156_vm0, %v411_v37  ;;  %v286_v44 = vadd.f32 %v281_v36, %v266_v41 }
 0x22a   :  { %815 = vmatpush.xpose.msk.msra.mxu2 %vm156_vm0, %v409_v38 }
 0x22d   :  { %v407_v24 = vpop.permute.xlu0 %406  ;;  %v405_v28 = vpop.permute.xlu1 %404 }
 0x22e   :  { %816 = vmatpush.xpose.msk.msra.mxu2 %vm156_vm0, %v407_v24 }
 0x232   :  { %817 = vmatpush.xpose.msk.msra.mxu2 %vm156_vm0, %v405_v28 }
 0x235   :  { %v401_v40 = vpop.permute.xlu0 %400 }
 0x236   :  { %818 = vmatpush.xpose.msk.msra.mxu2 %vm156_vm0, %v403_v39  ;;  %v399_v42 = vpop.permute.xlu1 %398 }
 0x23a   :  { %819 = vmatpush.xpose.msk.msra.mxu2 %vm156_vm0, %v401_v40 }
 0x23d   :  { %v283_v43 = vpop.permute.xlu0 %282 }
 0x23e   :  { %820 = vmatpush.xpose.msk.msra.mxu2 %vm156_vm0, %v399_v42  ;;  %v287_v48 = vadd.f32 %v283_v43, %v267_v45  ;;  %v591_v43 = vld [vmem:[%s1503_s5 + $0x18] sm:$0xff]  ;;  %v588_v45 = vld [vmem:[%s1503_s5] sm:$0xff] }
 0x23f   :  { %610 = vmatpush.msrb.mxu1 %v591_v43  ;;  %v752_v43 = vld [vmem:[%s1506_s8 + $0x30] sm:$0xff] }
 0x241   :  { %821 = vmatmul.msk.f32.vlgmr.msra.gmra.mxu2 %vm156_vm0, %v286_v44  ;;  %v590_v44 = vld [vmem:[%s1503_s5 + $0x10] sm:$0xff] }
 0x242   :  { %611 = vmatpush.msrb.mxu1 %v590_v44  ;;  %v751_v44 = vld [vmem:[%s1506_s8 + $0x28] sm:$0xff] }
 0x245   :  { %v373_v47 = vpop.permute.xlu0 %372 }
 0x246   :  { %v389_v50 = vmul.f32 %v373_v47, %v1335_v4 }
 0x249   :  { %822 = vmatmul.msk.f32.gmra.mxu2 %vm156_vm0, %v287_v48 }
 0x24d   :  { %v371_v49 = vpop.permute.xlu0 %370 }
 0x24e   :  { %v388_v51 = vmul.f32 %v371_v49, %v1333_v63 }
 0x250   :  { %v857_v20 = vpack.i.bf16 %v388_v51, %v389_v50 }
 0x252   :  { %858 = vrot.lane.b32.xlu0 %v857_v20, %s1119_s9  ;;  %v487_v20 = vld [vmem:[#allocation13 + $0x8] sm:$0xff] }
 0x255   :  { %v369_v52 = vpop.permute.xlu0 %368 }
 0x256   :  { %v387_v54 = vmul.f32 %v369_v52, %v1335_v4 }
 0x25d   :  { %v367_v53 = vpop.permute.xlu0 %366 }
 0x25e   :  { %v386_v55 = vmul.f32 %v367_v53, %v1333_v63 }
 0x260   :  { %v862_v56 = vpack.i.bf16 %v386_v55, %v387_v54 }
 0x262   :  { %863 = vrot.lane.b32.xlu0 %v862_v56, %s1119_s9 }
 0x265   :  { %v365_v25 = vpop.permute.xlu0 %364 }
 0x266   :  { %v385_v34 = vmul.f32 %v365_v25, %v1335_v4 }
 0x26d   :  { %v359_v57 = vpop.permute.xlu0 %358 }
 0x26e   :  { %v382_v28 = vmul.f32 %v359_v57, %v1333_v63 }
 0x2c4   :  { %v453_v58 = vpop.f32.mrf.mxu2  ;;  %v859_v59 = vpop.permute.xlu0 %858 }
 0x2c5   :  { %v459_v62 = vmul.f32 0.35355338, %v453_v58  ;;  %v860_v1 = vunpack.i.l.bf16 %v859_v59  ;;  %v861_v3 = vunpack.i.h.bf16 %v859_v59 }
 0x2c7   :  { %573 = vmatpush.msrb.mxu0 %v860_v1  ;;  %v463_v5 = vadd.f32 %v461_v60, %v459_v62 }
 0x2c9   :  { %574 = vmatpush.msrb.mxu0 %v861_v3  ;;  %v466_v6 = vsel %vm465_vm8, %v463_v5, -inf }
 0x2ca   :  { %467 = vmax.xlane.f32.xlu1 %v466_v6 }
 0x2cc   :  { %v456_v9 = vpop.f32.mrf.mxu2 }
 0x2cd   :  { %v460_v11 = vmul.f32 0.35355338, %v456_v9 }
 0x2cf   :  { %v464_v12 = vadd.f32 %v462_v10, %v460_v11 }
 0x2d1   :  { %v469_v13 = vsel %vm465_vm8, %v464_v12, -inf }
 0x2d2   :  { %470 = vmax.xlane.f32.xlu2 %v469_v13 }
 0x2d4   :  { %v864_v14 = vpop.permute.xlu0 %863 }
 0x2d5   :  { %v865_v15 = vunpack.i.l.bf16 %v864_v14  ;;  %v866_v16 = vunpack.i.h.bf16 %v864_v14  ;;  %v666_v14 = vld [vmem:[#allocation10 + $0x18] sm:$0xff] }
 0x2d7   :  { %575 = vmatpush.msrb.mxu0 %v865_v15  ;;  %v664_v15 = vld [vmem:[#allocation10 + $0x8] sm:$0xff] }
 0x2d9   :  { %576 = vmatpush.msrb.mxu0 %v866_v16  ;;  %v663_v16 = vld [vmem:[#allocation10] sm:$0xff] }
 0x2e3   :  { %360 = vrot.lane.b32.xlu1 %v1301_v46, %s1119_s9  ;;  %v480_v46 = vld [vmem:[%s1508_s10 + $0x10] sm:$0xff] }
 0x2e4   :  { %507 = vmatpush.msra.mxu3 %v480_v46 }
 0x2ea   :  { %362 = vrot.lane.b32.xlu2 %v1328_v61, %s1119_s9  ;;  %v479_v61 = vld [vmem:[%s1508_s10 + $0x8] sm:$0xff] }
 0x2eb   :  { %508 = vmatpush.msra.mxu3 %v479_v61 }
 0x2ed   :  { %509 = vmatpush.msra.mxu3 %v478_v22 }
 0x2ef   :  { %685 = vmatpush.msrb.mxu3 %v666_v14 }
 0x33d   :  { %v468_v23 = vpop.xlane.xlu1 %467 }
 0x33e   :  { %v472_v26 = vsub.f32 %v463_v5, %v468_v23 }
 0x340   :  { %v474_v27 = vmul.f32 1.442695, %v472_v26 }
 0x342   :  { %885 = vpow2.f32 %v474_v27 }
 0x345   :  { %v471_v29 = vpop.xlane.xlu2 %470 }
 0x346   :  { %v473_v30 = vsub.f32 %v464_v12, %v471_v29  ;;  %v878_v29 = vld [vmem:[%s1504_s6] ss:$0 sm:$0xff] }
 0x348   :  { %v886_v31 = vpop.eup %885  ;;  %v476_v32 = vmul.f32 1.442695, %v473_v30 }
 0x349   :  { %823 = vmatmul.msk.f32.vlgmr.msra.gmra.mxu3 %vm465_vm8, %v886_v31 }
 0x34a   :  { %887 = vpow2.f32 %v476_v32 }
 0x34d   :  { %v363_v33 = vpop.permute.xlu2 %362 }
 0x34e   :  { %v384_v35 = vmul.f32 %v363_v33, %v1333_v63  ;;  %v589_v63 = vld [vmem:[%s1503_s5 + $0x8] sm:$0xff] }
 0x34f   :  { %612 = vmatpush.msrb.mxu1 %v589_v63 }
 0x350   :  { %v888_v37 = vpop.eup %887  ;;  %v867_v38 = vpack.i.bf16 %v384_v35, %v385_v34 }
 0x351   :  { %824 = vmatmul.msk.f32.gmra.mxu3 %vm465_vm8, %v888_v37  ;;  %613 = vmatpush.msrb.mxu1 %v588_v45  ;;  %v749_v45 = vld [vmem:[%s1506_s8 + $0x18] sm:$0xff] }
 0x352   :  { %868 = vrot.lane.b32.xlu2 %v867_v38, %s1119_s9 }
 0x355   :  { %v361_v24 = vpop.permute.xlu1 %360 }
 0x356   :  { %v383_v39 = vmul.f32 %v361_v24, %v1335_v4  ;;  %v486_v4 = vld [vmem:[#allocation13] sm:$0xff] }
 0x358   :  { %v872_v40 = vpack.i.bf16 %v382_v28, %v383_v39 }
 0x35a   :  { %873 = vrot.lane.b32.xlu1 %v872_v40, %s1119_s9 }
 0x3ac   :  { %v869_v36 = vpop.permute.xlu2 %868 }
 0x3ad   :  { %v870_v41 = vunpack.i.l.bf16 %v869_v36  ;;  %v871_v42 = vunpack.i.h.bf16 %v869_v36 }
 0x3af   :  { %577 = vmatpush.msrb.mxu0 %v870_v41 }
 0x3b1   :  { %578 = vmatpush.msrb.mxu0 %v871_v42  ;;  %v753_v42 = vld [vmem:[%s1506_s8 + $0x38] sm:$0xff] }
 0x3b2   :  { %835 = vmatpush.msra.mxu1 %v753_v42 }
 0x3b4   :  { %836 = vmatpush.msra.mxu1 %v752_v43 }
 0x3b6   :  { %837 = vmatpush.msra.mxu1 %v751_v44 }
 0x3cc   :  { %v511_v47 = vpop.f32.mrf.mxu3  ;;  %v874_v48 = vpop.permute.xlu1 %873 }
 0x3cd   :  { %v512_v49 = vadd.f32 %v511_v47, %v486_v4  ;;  %v875_v50 = vunpack.i.l.bf16 %v874_v48  ;;  %v876_v51 = vunpack.i.h.bf16 %v874_v48  ;;  %v750_v4 = vld [vmem:[%s1506_s8 + $0x20] sm:$0xff]  ;;  %v748_v47 = vld [vmem:[%s1506_s8 + $0x10] sm:$0xff]  ;;  %v747_v48 = vld [vmem:[%s1506_s8 + $0x8] sm:$0xff] }
 0x3ce   :  { %838 = vmatpush.msra.mxu1 %v750_v4 }
 0x3cf   :  { %889 = vrcp.f32 %v512_v49  ;;  %579 = vmatpush.msrb.mxu0 %v875_v50 }
 0x3d0   :  { %839 = vmatpush.msra.mxu1 %v749_v45 }
 0x3d1   :  { %580 = vmatpush.msrb.mxu0 %v876_v51 }
 0x3d2   :  { %840 = vmatpush.msra.mxu1 %v748_v47 }
 0x3d3   :  { %768 = vmatpush.msra.mxu0 %v753_v42 }
 0x3d4   :  { %v514_v52 = vpop.f32.mrf.mxu3  ;;  %841 = vmatpush.msra.mxu1 %v747_v48 }
 0x3d5   :  { %v890_v53 = vpop.eup %889  ;;  %v515_v54 = vadd.f32 %v514_v52, %v487_v20  ;;  %769 = vmatpush.msra.mxu0 %v752_v43 }
 0x3d6   :  { %v519_v55 = vmul.f32 %v890_v53, %v512_v49 }
 0x3d7   :  { %891 = vrcp.f32 %v515_v54  ;;  %770 = vmatpush.msra.mxu0 %v751_v44 }
 0x3d8   :  { %v521_v56 = vsub.f32 2.0, %v519_v55 }
 0x3d9   :  { %771 = vmatpush.msra.mxu0 %v750_v4 }
 0x3da   :  { %v523_v25 = vmul.f32 %v890_v53, %v521_v56  ;;  %v746_v53 = vld [vmem:[%s1506_s8] sm:$0xff]  ;;  %s1120_s8 = smov [#allocation14]  }
 0x3db   :  { %772 = vmatpush.msra.mxu0 %v749_v45  ;;  %842 = vmatpush.msra.mxu1 %v746_v53  ;;  %s791_s4 = sshll.u32 %s1120_s8, 4  ;;  %s792_s4 = int_to_ptr.vmem [resolvable:$true] %s791_s4 }
 0x3dc   :  { %v525_v57 = vmul.f32 %v886_v31, %v523_v25 }
 0x3dd   :  { %v892_v58 = vpop.eup %891  ;;  %773 = vmatpush.msra.mxu0 %v748_v47 }
 0x3de   :  { %v520_v59 = vmul.f32 %v892_v58, %v515_v54  ;;  %825 = vmatmul.msk.f32.vlgmr.msrb.gmra.mxu0 %vm465_vm8, %v525_v57 }
 0x3df   :  { %774 = vmatpush.msra.mxu0 %v747_v48 }
 0x3e0   :  { %v522_v60 = vsub.f32 2.0, %v520_v59 }
 0x3e1   :  { %775 = vmatpush.msra.mxu0 %v746_v53 }
 0x3e2   :  { %v524_v62 = vmul.f32 %v892_v58, %v522_v60 }
 0x3e4   :  { %v526_v1 = vmul.f32 %v888_v37, %v524_v62 }
 0x3e6   :  { %826 = vmatmul.msk.f32.gmra.mxu0 %vm465_vm8, %v526_v1 }
 0x45b   :  { %v582_v3 = vpop.f32.mrf.mxu0 }
 0x45c   :  { %827 = vmatmul.msk.f32.vlgmr.msrb.gmra.mxu1 %vm156_vm0, %v582_v3 }
 0x463   :  { %v585_v5 = vpop.f32.mrf.mxu0 }
 0x464   :  { %828 = vmatmul.msk.f32.gmra.mxu1 %vm156_vm0, %v585_v5 }
 0x4d9   :  { %v615_v6 = vpop.f32.mrf.mxu1 }
 0x4da   :  { %v1435_v7 = vadd.f32 %v615_v6, %v1230_v0  ;;  %v665_v0 = vld [vmem:[#allocation10 + $0x10] sm:$0xff] }
 0x4db   :  { %686 = vmatpush.msrb.mxu3 %v665_v0 }
 0x4dc   :  { %v623_v8 = vmul.f32 %v1435_v7, %v1435_v7  ;;  %v659_v34 = vmul.f32 %v878_v29, %v1435_v7 }
 0x4dd   :  { %687 = vmatpush.msrb.mxu3 %v664_v15 }
 0x4de   :  { %v625_v9 = vsel %vm156_vm0, %v623_v8, 0.0 }
 0x4df   :  { %626 = vadd.xlane.f32.xlu0 %v625_v9  ;;  %688 = vmatpush.msrb.mxu3 %v663_v16 }
 0x4e1   :  { %v618_v10 = vpop.f32.mrf.mxu1 }
 0x4e2   :  { %v1441_v11 = vadd.f32 %v618_v10, %v1234_v2 }
 0x4e4   :  { %v624_v12 = vmul.f32 %v1441_v11, %v1441_v11  ;;  %v660_v39 = vmul.f32 %v878_v29, %v1441_v11 }
 0x4e6   :  { %v628_v13 = vsel %vm156_vm0, %v624_v12, 0.0 }
 0x4e7   :  { %629 = vadd.xlane.f32.xlu2 %v628_v13 }
 0x552   :  { %v627_v17 = vpop.xlane.xlu0 %626 }
 0x553   :  { %v631_v18 = vmul.f32 %v627_v17, %v1268_v21 }
 0x555   :  { %v633_v19 = vadd.f32 1e-05, %v631_v18 }
 0x557   :  { %893 = vrsqrt.f32 %v633_v19  ;;  %vm641_vm10 = vweird.f32 %v633_v19 }
 0x55a   :  { %v630_v2 = vpop.xlane.xlu2 %629 }
 0x55b   :  { %v632_v46 = vmul.f32 %v630_v2, %v1268_v21 }
 0x55d   :  { %v894_v61 = vpop.eup %893  ;;  %v634_v22 = vadd.f32 1e-05, %v632_v46 }
 0x55e   :  { %v636_v23 = vmul.f32 %v894_v61, %v633_v19  ;;  %vm642_vm9 = vweird.f32 %v894_v61 }
 0x55f   :  { %895 = vrsqrt.f32 %v634_v22  ;;  %vm643_vm11 = vmor %vm641_vm10, %vm642_vm9  ;;  %vm651_vm13 = vweird.f32 %v634_v22 }
 0x560   :  { %v637_v26 = vmul.f32 %v894_v61, %v636_v23 }
 0x562   :  { %v638_v27 = vmul.f32 0.5, %v637_v26 }
 0x564   :  { %v639_v30 = vsub.f32 1.5, %v638_v27 }
 0x565   :  { %v896_v31 = vpop.eup %895 }
 0x566   :  { %v640_v32 = vmul.f32 %v894_v61, %v639_v30  ;;  %v646_v33 = vmul.f32 %v896_v31, %v634_v22  ;;  %vm652_vm12 = vweird.f32 %v896_v31 }
 0x567   :  { %vm653_vm14 = vmor %vm651_vm13, %vm652_vm12 }
 0x568   :  { %v647_v21 = vmul.f32 %v896_v31, %v646_v33  ;;  %v644_v35 = vsel %vm643_vm11, %v894_v61, %v640_v32 }
 0x569   :  { %v661_v37 = vmul.f32 %v659_v34, %v644_v35 }
 0x56a   :  { %v648_v38 = vmul.f32 0.5, %v647_v21 }
 0x56b   :  { %829 = vmatmul.msk.f32.vlgmr.msrb.gmra.mxu3 %vm156_vm0, %v661_v37 }
 0x56c   :  { %v649_v24 = vsub.f32 1.5, %v648_v38 }
 0x56e   :  { %v650_v28 = vmul.f32 %v896_v31, %v649_v24 }
 0x570   :  { %v654_v40 = vsel %vm653_vm14, %v896_v31, %v650_v28 }
 0x571   :  { %v662_v36 = vmul.f32 %v660_v39, %v654_v40 }
 0x573   :  { %830 = vmatmul.msk.f32.gmra.mxu3 %vm156_vm0, %v662_v36 }
 0x5ee   :  { %v690_v41 = vpop.f32.mrf.mxu3 }
 0x5ef   :  { %738 = vrot.lane.b32.xlu1 %v690_v41, %s1119_s9  ;;  %v831_v49 = vmul.f32 -1.442695, %v690_v41 }
 0x5f1   :  { %897 = vpow2.f32 %v831_v49 }
 0x5f6   :  { %v1465_v63 = vpop.f32.mrf.mxu3 }
 0x5f7   :  { %740 = vrot.lane.b32.xlu1 %v1465_v63, %s1119_s9  ;;  %v832_v50 = vmul.f32 -1.442695, %v1465_v63  ;;  %v898_v51 = vpop.eup %897 }
 0x5f8   :  { %v702_v20 = vadd.f32 1.0, %v898_v51 }
 0x5f9   :  { %899 = vpow2.f32 %v832_v50 }
 0x5fa   :  { %901 = vrcp.f32 %v702_v20  ;;  %v715_v1 = vand.u32 2147483648, %v702_v20  ;;  %vm709_vm1 = vweird.f32 %v702_v20  ;;  %v713_v3 = vand.u32 2147483647, %v702_v20 }
 0x5fc   :  { %v716_v8 = vor.u32 1.1754944e-38, %v715_v1  ;;  %vm714_vm3 = vcmp.eq.f32.partialorder %v713_v3, 8.507059e+37 }
 0x5ff   :  { %v900_v52 = vpop.eup %899 }
 0x600   :  { %v703_v54 = vadd.f32 1.0, %v900_v52  ;;  %v902_v55 = vpop.eup %901 }
 0x601   :  { %v705_v56 = vmul.f32 %v902_v55, %v702_v20  ;;  %vm710_vm15 = vweird.f32 %v902_v55 }
 0x602   :  { %903 = vrcp.f32 %v703_v54  ;;  %vm711_vm2 = vmor %vm709_vm1, %vm710_vm15  ;;  %v730_v12 = vand.u32 2147483648, %v703_v54  ;;  %vm724_vm5 = vweird.f32 %v703_v54  ;;  %v728_v13 = vand.u32 2147483647, %v703_v54 }
 0x603   :  { %v706_v25 = vsub.f32 1.0, %v705_v56 }
 0x604   :  { %v731_v17 = vor.u32 1.1754944e-38, %v730_v12  ;;  %vm729_vm7 = vcmp.eq.f32.partialorder %v728_v13, 8.507059e+37 }
 0x605   :  { %v707_v59 = vmul.f32 %v902_v55, %v706_v25 }
 0x607   :  { %v708_v62 = vadd.f32 %v902_v55, %v707_v59 }
 0x608   :  { %v904_v57 = vpop.eup %903 }
 0x609   :  { %v720_v58 = vmul.f32 %v904_v57, %v703_v54  ;;  %v712_v6 = vsel %vm711_vm2, %v902_v55, %v708_v62  ;;  %vm725_vm4 = vweird.f32 %v904_v57 }
 0x60a   :  { %v717_v9 = vsel %vm714_vm3, %v716_v8, %v712_v6  ;;  %vm726_vm6 = vmor %vm724_vm5, %vm725_vm4 }
 0x60b   :  { %v721_v60 = vsub.f32 1.0, %v720_v58  ;;  %v734_v14 = vmul.f32 %v717_v9, %v690_v41 }
 0x60d   :  { %v722_v5 = vmul.f32 %v904_v57, %v721_v60 }
 0x60f   :  { %v723_v10 = vadd.f32 %v904_v57, %v722_v5 }
 0x611   :  { %v727_v15 = vsel %vm726_vm6, %v904_v57, %v723_v10 }
 0x612   :  { %v732_v18 = vsel %vm729_vm7, %v731_v17, %v727_v15 }
 0x613   :  { %v735_v19 = vmul.f32 %v732_v18, %v1465_v63 }
 0x661   :  { %v739_v0 = vpop.permute.xlu1 %738 }
 0x662   :  { %v744_v16 = vmul.f32 %v739_v0, %v734_v14 }
 0x664   :  { %833 = vmatmul.msk.f32.vlgmr.msra.gmra.mxu0 %vm465_vm8, %v744_v16 }
 0x669   :  { %v741_v2 = vpop.permute.xlu1 %740 }
 0x66a   :  { %v745_v46 = vmul.f32 %v741_v2, %v735_v19 }
 0x66c   :  { %834 = vmatmul.msk.f32.vlgmr.msra.gmra.mxu1 %vm465_vm8, %v745_v46 }
 0x6e1   :  { %v777_v61 = vpop.f32.mrf.mxu0 }
 0x6e2   :  { %v783_v22 = vadd.f32 %v777_v61, %v1435_v7 }
 0x6e4   :  { %785 = vst.msk [vmem:[#allocation14] sm:$0xff] %vm156_vm0, %v783_v22 }
 0x6e9   :  { %v780_v23 = vpop.f32.mrf.mxu1 }
 0x6ea   :  { %v784_v26 = vadd.f32 %v780_v23, %v1441_v11 }
 0x6ec   :  { %786 = vst.msk [vmem:[#allocation14 + $0x8] sm:$0xff] %vm156_vm0, %v784_v26 }
 0x6ed   :  { %799 = dma.vmem_to_hbm [thread:$0]  %s792_s4, 256, %s794_s11, [#allocation4], %s1109_s1, %s1109_s1, %s1110_s21  }
 0x6ee   :  { %1105 = dma.done.wait [#allocation4], 256  }
 0x6ef   :  { %1106 = vsyncadd [#allocation4], 4294967040 }
 0x6f0   :  { %804 = vsyncpa [#allocation3], 1 }
 0x6f1   :  { %805 = vsyncpa [#allocation6], 1 }
 0x6f2   :  { %806 = vsyncpa [#allocation9], 1 }
 0x6f3   :  { %807 = vsyncpa [#allocation12], 1 }
 0x6f4   :  { %808 = vsyncpa [#allocation4], 1 }

</bundles_post_ra>
